<compile_context>
chip_gen: v5e
topology: v5e:2x2
jax: 0.10.0
libtpu: 0.0.40
codegen_flags: <defaults>
</compile_context>

<pallas_src>
import functools
import math

import jax
import jax.numpy as jnp
from jax.experimental import pallas as pl
from jax.experimental.pallas import tpu as pltpu

EPS = 1e-5          # torch_geometric GraphNorm eps
LANE = 128
SUBLANE = 8


def _round_up(v, m):
    return (v + m - 1) // m * m


# --------------------------------------------------------------------------- #
# kernel 0: feature transform  h = x @ W   (bf16 MXU, f32 accumulate)
# --------------------------------------------------------------------------- #
def _xw_kernel(x_ref, w_ref, h_ref):
    h_ref[...] = jnp.dot(x_ref[...], w_ref[...],
                         preferred_element_type=jnp.float32).astype(h_ref.dtype)


# --------------------------------------------------------------------------- #
# kernel 1: message passing  agg = A @ h, + bias, ReLU, per-graph partial stats
# --------------------------------------------------------------------------- #
def _conv_relu_stats_kernel(nnz_ref, cols_ref,                  # scalar prefetch (SMEM)
                            adj_ref, h_ref, seg_ref, bias_ref,  # VMEM inputs
                            y_ref, s1_ref, s2_ref,              # VMEM outputs
                            acc_ref,                            # VMEM scratch (f32)
                            *, tk, h_resident):
    i = pl.program_id(0)          # node-row tile
    k = pl.program_id(1)          # compacted adjacency column tile (reduction axis)

    @pl.when(k == 0)
    def _init():
        acc_ref[...] = jnp.zeros_like(acc_ref)

    # Only the first nnz_ref[i] compacted column tiles carry edges for this row
    # tile; the remaining steps repeat the previous block index, so they issue
    # neither DMA nor MXU work.
    @pl.when(k < nnz_ref[i])
    def _accumulate():
        if h_resident:
            # h is fully resident in VMEM; slice the needed tk rows directly.
            off = pl.multiple_of(cols_ref[i, k] * tk, tk)
            h_blk = h_ref[pl.ds(off, tk), :]
        else:
            h_blk = h_ref[...]
        acc_ref[...] += jnp.dot(adj_ref[...], h_blk,
                                preferred_element_type=jnp.float32)

    @pl.when(k == pl.num_programs(1) - 1)
    def _finalize():
        y = jnp.maximum(acc_ref[...] + bias_ref[...], 0.0)       # conv bias + ReLU (f32)
        y_ref[...] = y.astype(y_ref.dtype)                       # bf16 writeback
        seg = seg_ref[...]                                       # [Gp, TM] one-hot (bf16)
        # Stats are taken from the f32 accumulator (before the bf16 downcast).
        s1_ref[0] = jnp.dot(seg, y, preferred_element_type=jnp.float32)
        s2_ref[0] = jnp.dot(seg, y * y, preferred_element_type=jnp.float32)


# --------------------------------------------------------------------------- #
# kernel 2: GraphNorm normalization from precomputed per-graph scale / offset
# --------------------------------------------------------------------------- #
def _graphnorm_kernel(y_ref, segt_ref, scale_ref, off_ref, out_ref):
    segt = segt_ref[...]                                         # [TM, Gp] one-hot (bf16)
    scale_n = jnp.dot(segt, scale_ref[...], preferred_element_type=jnp.float32)
    off_n = jnp.dot(segt, off_ref[...], preferred_element_type=jnp.float32)
    out_ref[...] = y_ref[...].astype(jnp.float32) * scale_n + off_n


# --------------------------------------------------------------------------- #
# wrapper: GCNBlock.forward(x, edge_index, edge_attr, batch_index)
# --------------------------------------------------------------------------- #
def gcn_block(x, edge_index, edge_attr, batch_index, num_graphs,
              w, bias, gamma, beta, mean_scale,
              *, tm=512, tk=512, matmul_dtype=jnp.bfloat16, max_nnz_blocks=None):
    """GCNConv(normalize=False, add_self_loops=False) -> ReLU -> GraphNorm."""
    N, c_in = x.shape
    c_out = w.shape[1]
    f32 = jnp.float32

    assert tm % LANE == 0 and tk % LANE == 0, "tiles must be multiples of 128"
    n_pad = _round_up(N, math.lcm(tm, tk))
    c_out_p = _round_up(c_out, LANE)          # lane-dense output (no masked stores)
    g_pad = _round_up(num_graphs, SUBLANE)
    nmb = n_pad // tm
    nkb = n_pad // tk
    nkb_grid = nkb if max_nnz_blocks is None else max(1, min(nkb, int(max_nnz_blocks)))

    # Keep h fully VMEM-resident in kernel 1 when it comfortably fits.
    h_resident = (n_pad * c_out_p * 2) <= 12 * 1024 * 1024

    # ---- glue: padded dense operands -------------------------------------------
    src, dst = edge_index[0], edge_index[1]
    # Scatter-add in f32 (duplicate edges accumulate exactly), cast to bf16 once;
    # no further XLA passes read the O(N^2) adjacency.
    adj = (jnp.zeros((n_pad, n_pad), f32)
           .at[dst, src].add(edge_attr.astype(f32))
           .astype(matmul_dtype))
    x_p = jnp.zeros((n_pad, c_in), matmul_dtype).at[:N].set(x.astype(matmul_dtype))
    w_p = jnp.zeros((c_in, c_out_p), matmul_dtype).at[:, :c_out].set(w.astype(matmul_dtype))

    batch_p = jnp.full((n_pad,), -1, jnp.int32).at[:N].set(batch_index.astype(jnp.int32))
    onehot = (batch_p[None, :] == jnp.arange(g_pad, dtype=jnp.int32)[:, None])
    counts = onehot.sum(axis=1).astype(f32)                           # exact integer counts
    inv_cnt = jnp.where(counts > 0, 1.0 / jnp.maximum(counts, 1.0), 0.0).reshape(g_pad, 1)
    seg = onehot.astype(matmul_dtype)                                 # [Gp, n_pad] one-hot
    segt = seg.T                                                      # [n_pad, Gp]

    def pad_row(v):                            # [C] -> [1, c_out_p]
        return jnp.zeros((1, c_out_p), f32).at[0, :c_out].set(v.astype(f32))

    bias_p, gamma_p, beta_p, alpha_p = map(pad_row, (bias, gamma, beta, mean_scale))

    # ---- glue: block-sparsity metadata from edge block coordinates (O(E)) --------
    bi = (dst // tm).astype(jnp.int32)
    bk = (src // tk).astype(jnp.int32)
    blk_cnt = jnp.zeros((nmb, nkb), jnp.int32).at[bi, bk].add(1)
    blk_nz = blk_cnt > 0                                                     # [nmb, nkb]
    nnz = blk_nz.sum(axis=1).astype(jnp.int32)                              # [nmb]
    ids = jnp.where(blk_nz, jnp.arange(nkb, dtype=jnp.int32)[None, :], nkb)
    ids = jnp.sort(ids, axis=1)                                             # nonzero ids first
    last = jnp.take_along_axis(ids, jnp.maximum(nnz - 1, 0)[:, None], axis=1)
    last = jnp.where(nnz[:, None] > 0, last, 0)
    cols = jnp.where(ids >= nkb, last, ids).astype(jnp.int32)               # [nmb, nkb]

    cparams = functools.partial(pltpu.CompilerParams,
                                vmem_limit_bytes=48 * 1024 * 1024)

    # ---- kernel 0: h = x @ W -----------------------------------------------------
    h = pl.pallas_call(
        _xw_kernel,
        out_shape=jax.ShapeDtypeStruct((n_pad, c_out_p), matmul_dtype),
        grid=(nmb,),
        in_specs=[pl.BlockSpec((tm, c_in), lambda i: (i, 0)),
                  pl.BlockSpec((c_in, c_out_p), lambda i: (0, 0))],
        out_specs=pl.BlockSpec((tm, c_out_p), lambda i: (i, 0)),
        compiler_params=cparams(dimension_semantics=("parallel",)),
    )(x_p, w_p)

    if h_resident:
        h_spec = pl.BlockSpec((n_pad, c_out_p), lambda i, k, nnz, cols: (0, 0))
    else:
        h_spec = pl.BlockSpec((tk, c_out_p), lambda i, k, nnz, cols: (cols[i, k], 0))

    # ---- kernel 1: A @ h + bias, ReLU, per-graph partial sums --------------------
    y, part1, part2 = pl.pallas_call(
        functools.partial(_conv_relu_stats_kernel, tk=tk, h_resident=h_resident),
        out_shape=(jax.ShapeDtypeStruct((n_pad, c_out_p), matmul_dtype),
                   jax.ShapeDtypeStruct((nmb, g_pad, c_out_p), f32),
                   jax.ShapeDtypeStruct((nmb, g_pad, c_out_p), f32)),
        grid_spec=pltpu.PrefetchScalarGridSpec(
            num_scalar_prefetch=2,
            grid=(nmb, nkb_grid),
            in_specs=[
                pl.BlockSpec((tm, tk), lambda i, k, nnz, cols: (i, cols[i, k])),
                h_spec,
                pl.BlockSpec((g_pad, tm), lambda i, k, nnz, cols: (0, i)),
                pl.BlockSpec((1, c_out_p), lambda i, k, nnz, cols: (0, 0)),
            ],
            out_specs=[
                pl.BlockSpec((tm, c_out_p), lambda i, k, nnz, cols: (i, 0)),
                pl.BlockSpec((1, g_pad, c_out_p), lambda i, k, nnz, cols: (i, 0, 0)),
                pl.BlockSpec((1, g_pad, c_out_p), lambda i, k, nnz, cols: (i, 0, 0)),
            ],
            scratch_shapes=[pltpu.VMEM((tm, c_out_p), f32)],
        ),
        compiler_params=cparams(dimension_semantics=("parallel", "arbitrary")),
    )(nnz, cols, adj, h, seg, bias_p)

    # ---- glue: tiny [G, C] statistics math (hoisted out of kernel 2) -------------
    s1 = part1.sum(axis=0)                        # [Gp, C]  sum(y)
    s2 = part2.sum(axis=0)                        # [Gp, C]  sum(y^2)
    mean_g = s1 * inv_cnt                         # E[y]
    ey2_g = s2 * inv_cnt                          # E[y^2]
    # Var[y - alpha*mean] = E[y^2] - (2*alpha - alpha^2) * mean^2  (clamped at 0)
    var_g = jnp.maximum(ey2_g - (2.0 - alpha_p) * alpha_p * mean_g * mean_g, 0.0)
    inv_std_g = jax.lax.rsqrt(var_g + EPS)
    scale_g = gamma_p * inv_std_g                 # [Gp, C]
    off_g = beta_p - alpha_p * mean_g * scale_g   # [Gp, C]

    # ---- kernel 2: GraphNorm normalize --------------------------------------------
    out = pl.pallas_call(
        _graphnorm_kernel,
        out_shape=jax.ShapeDtypeStruct((n_pad, c_out_p), f32),
        grid=(nmb,),
        in_specs=[
            pl.BlockSpec((tm, c_out_p), lambda i: (i, 0)),      # y (bf16)
            pl.BlockSpec((tm, g_pad), lambda i: (i, 0)),        # node->graph one-hot rows
            pl.BlockSpec((g_pad, c_out_p), lambda i: (0, 0)),   # gamma * inv_std
            pl.BlockSpec((g_pad, c_out_p), lambda i: (0, 0)),   # beta - alpha*mean*scale
        ],
        out_specs=pl.BlockSpec((tm, c_out_p), lambda i: (i, 0)),
        compiler_params=cparams(dimension_semantics=("parallel",)),
    )(y, segt, scale_g, off_g)

    return out[:N, :c_out]


# --------------------------------------------------------------------------- #
# pure-JAX reference (torch_geometric GCNConv + GraphNorm semantics), using the
# same mixed-precision policy as the kernel: the message-passing matmul operands
# (x, W, edge weights, h) are bfloat16, the intermediate y is stored in bfloat16
# between the conv and the normalization, and all accumulation / statistics are
# float32.
# --------------------------------------------------------------------------- #
def reference(x, w, bias, edge_index, edge_attr, batch_index, counts,
              gamma, beta, mean_scale, num_graphs, matmul_dtype=jnp.bfloat16):
    f32 = jnp.float32
    h = jnp.dot(x.astype(matmul_dtype), w.astype(matmul_dtype)).astype(f32)
    ew = edge_attr.astype(matmul_dtype).astype(f32)
    src, dst = edge_index[0], edge_index[1]
    agg = jax.ops.segment_sum(h[src] * ew[:, None], dst, num_segments=x.shape[0])
    y = jax.nn.relu(agg + bias[None, :])
    y_q = y.astype(matmul_dtype).astype(f32)      # value path stored bf16 between kernels
    cnt = counts.reshape(num_graphs, 1)
    mean = jax.ops.segment_sum(y, batch_index, num_segments=num_graphs) / cnt
    centered = y - mean[batch_index] * mean_scale[None, :]
    var = jax.ops.segment_sum(centered * centered, batch_index,
                              num_segments=num_graphs) / cnt
    std = jnp.sqrt(var + EPS)
    centered_q = y_q - mean[batch_index] * mean_scale[None, :]
    return gamma[None, :] * centered_q / std[batch_index] + beta[None, :]


if __name__ == "__main__":
    key = jax.random.PRNGKey(0)
    N, C_IN, C_OUT, G, E = 16, 8, 32, 2, 48

    k_x, k_w, k_e, k_ea, k_b, k_g, k_be, k_ms = jax.random.split(key, 8)

    # Inputs are made bf16-representable so kernel and reference quantize identically.
    bf = lambda a: a.astype(jnp.bfloat16).astype(jnp.float32)

    x = bf(jax.random.normal(k_x, (N, C_IN), jnp.float32))
    w = bf(jax.random.normal(k_w, (C_IN, C_OUT), jnp.float32) * (1.0 / jnp.sqrt(C_IN)))
    bias = 0.1 * jax.random.normal(k_b, (C_OUT,), jnp.float32)          # GCNConv bias

    # GraphNorm learnable parameters.
    gamma = jax.random.uniform(k_g, (C_OUT,), jnp.float32, 0.75, 1.25)
    beta = 0.1 * jax.random.normal(k_be, (C_OUT,), jnp.float32)
    mean_scale = jax.random.uniform(k_ms, (C_OUT,), jnp.float32, 0.75, 1.25)

    # Graph structure: E distinct directed edges, positive weights, two graphs.
    pairs = jax.random.permutation(k_e, N * N)[:E]
    src = (pairs // N).astype(jnp.int32)
    dst = (pairs % N).astype(jnp.int32)
    edge_index = jnp.stack([src, dst], axis=0)
    edge_attr = bf(jax.random.uniform(k_ea, (E,), jnp.float32, 0.1, 1.0))
    batch_index = jnp.concatenate([jnp.zeros(N // 2, jnp.int32),
                                   jnp.ones(N - N // 2, jnp.int32)])

    out = gcn_block(x, edge_index, edge_attr, batch_index, G,
                    w, bias, gamma, beta, mean_scale)
    out = jax.block_until_ready(out)

    counts = jnp.bincount(batch_index, length=G).astype(jnp.float32)
    ref = reference(x, w, bias, edge_index, edge_attr, batch_index, counts,
                    gamma, beta, mean_scale, G)

    assert out.shape == (N, C_OUT)
    assert bool(jnp.all(jnp.isfinite(out)))
    # Tolerance sized for the bf16 message-passing matmuls / bf16 y staging (the
    # reference mirrors the same mixed-precision policy; remaining differences are
    # accumulation-order level).
    assert jnp.allclose(out, ref, rtol=3e-2, atol=3e-2), "mismatch vs pure-JAX reference"

    print("KERNEL_OK")
</pallas_src>

<mosaic_0001>
module attributes {stable_mosaic.version = 11 : i64} {
  func.func @_xw_kernel(%arg0: i32, %arg1: memref<512x8xbf16, #tpu.memory_space<vmem>>, %arg2: memref<8x128xbf16, #tpu.memory_space<vmem>>, %arg3: memref<512x128xbf16, #tpu.memory_space<vmem>>) attributes {dimension_semantics = [#tpu.dimension_semantics<parallel>], iteration_bounds = array<i64: 1>, scalar_prefetch = 0 : i64, scratch_operands = 0 : i64, tpu.core_type = #tpu.core_type<tc>, window_params = [{transform_indices = @transform_0, window_bounds = array<i64: 512, 8>}, {pipeline_mode = #tpu.pipeline_mode<synchronous>, transform_indices = @transform_1, window_bounds = array<i64: 8, 128>}, {transform_indices = @transform_2, window_bounds = array<i64: 512, 128>}]} {
    %c0 = arith.constant 0 : index
    %c0_0 = arith.constant 0 : index
    %0 = vector.load %arg1[%c0, %c0_0] : memref<512x8xbf16, #tpu.memory_space<vmem>>, vector<512x8xbf16>
    %c0_1 = arith.constant 0 : index
    %c0_2 = arith.constant 0 : index
    %1 = vector.load %arg2[%c0_1, %c0_2] : memref<8x128xbf16, #tpu.memory_space<vmem>>, vector<8x128xbf16>
    %cst = arith.constant dense<0.000000e+00> : vector<512x128xf32>
    %2 = tpu.matmul %0, %1, %cst {dimension_numbers = #tpu.dot_dimension_numbers<[1], [0], [0], [1], [0, 0, 1, 1], [], []>} : vector<512x8xbf16>, vector<8x128xbf16>, vector<512x128xf32> -> vector<512x128xf32>
    %3 = arith.truncf %2 : vector<512x128xf32> to vector<512x128xbf16>
    %c0_3 = arith.constant 0 : index
    %c0_4 = arith.constant 0 : index
    %4 = vector.load %arg3[%c0_3, %c0_4] : memref<512x128xbf16, #tpu.memory_space<vmem>>, vector<512x128xbf16>
    tpu.vector_store %arg3[%c0_3, %c0_4], %3 {strides = array<i32>} : memref<512x128xbf16, #tpu.memory_space<vmem>>, vector<512x128xbf16>,
    return
  }
  func.func @transform_0(%arg0: i32) -> (i32, i32) {
    %c0_i32 = arith.constant 0 : i32
    %c0_i32_0 = arith.constant 0 : i32
    return %arg0, %c0_i32 : i32, i32
  }
  func.func @transform_1(%arg0: i32) -> (i32, i32) {
    %c0_i32 = arith.constant 0 : i32
    %c0_i32_0 = arith.constant 0 : i32
    %c0_i32_1 = arith.constant 0 : i32
    return %c0_i32, %c0_i32_0 : i32, i32
  }
  func.func @transform_2(%arg0: i32) -> (i32, i32) {
    %c0_i32 = arith.constant 0 : i32
    %c0_i32_0 = arith.constant 0 : i32
    return %arg0, %c0_i32 : i32, i32
  }
}

</mosaic_0001>

<bundles_post_ra>
// kernel: tpu_custom_call.1
= control target key start
LH: loop header
LB: loop body
LE: loop exit
PB: predicated region body
PF: predicated region fallthrough
CT: control target
= control target key end

     0   :  { %vm335_vm0 = vcmask 1043456   ;;  %vm238_vm1 = vcmask 64512   ;;  %s1221_s0 = inlined_call_operand.vmem [shape: bf16[512,8], index: 0, kind: input, shape index: {}]   ;;  %s1222_s1 = inlined_call_operand.vmem [shape: bf16[8,128], index: 1, kind: input, shape index: {}]   ;;  %s1223_s2 = inlined_call_operand.hbm [shape: bf16[512,128], index: 2, kind: output, shape index: {}]  }
   0x1   :  { %v77_v0 = vld [vmem:[%s1222_s1] sm:$0xf] }
   0x2   :  { %v337_v1 = vsel %vm335_vm0, %v77_v0, 0  ;;  %v814_v2 = vld [vmem:[%s1221_s0] sm:$0xff] }
   0x3   :  { %v822_v3 = vld [vmem:[%s1221_s0 + $0x40] sm:$0xff]  ;;  %346 = vmatpush.bf16.msra.mxu0 %v337_v1  ;;  %1037 = vmatpush.bf16.msra.mxu1 %v337_v1 }
   0x4   :  { %v830_v4 = vld [vmem:[%s1221_s0 + $0x80] sm:$0xff]  ;;  %1038 = vmatpush.bf16.msra.mxu2 %v337_v1  ;;  %1039 = vmatpush.bf16.msra.mxu3 %v337_v1 }
   0x5   :  { %v838_v5 = vld [vmem:[%s1221_s0 + $0xc0] sm:$0xff] }
   0x6   :  { %7 = vsyncpa [#allocation3], 0  ;;  %782 = vmatmul.msk.bf16.vlgmr.msra.gmra.mxu0 %vm238_vm1, %v814_v2  ;;  %790 = vmatmul.msk.bf16.vlgmr.msra.gmra.mxu1 %vm238_vm1, %v822_v3  ;;  %v815_v6 = vld [vmem:[%s1221_s0 + $0x8] sm:$0xff]  ;;  %v816_v10 = vld [vmem:[%s1221_s0 + $0x10] sm:$0xff]  ;;  %s642_s19 = sshll.u32 %s1223_s2, 4  ;;  %s1070_s20 = smov 64   ;;  %s643_s19 = int_to_ptr.hbm [resolvable:$true] %s642_s19 }
   0x7   :  { %798 = vmatmul.msk.bf16.vlgmr.msra.gmra.mxu2 %vm238_vm1, %v830_v4  ;;  %806 = vmatmul.msk.bf16.vlgmr.msra.gmra.mxu3 %vm238_vm1, %v838_v5  ;;  %v823_v7 = vld [vmem:[%s1221_s0 + $0x48] sm:$0xff]  ;;  %v824_v11 = vld [vmem:[%s1221_s0 + $0x50] sm:$0xff]  ;;  %v817_v14 = vld [vmem:[%s1221_s0 + $0x18] sm:$0xff]  ;;  %s1071_s21 = smov 4  }
   0x8   :  { %v831_v8 = vld [vmem:[%s1221_s0 + $0x88] sm:$0xff]  ;;  %v832_v12 = vld [vmem:[%s1221_s0 + $0x90] sm:$0xff]  ;;  %v825_v15 = vld [vmem:[%s1221_s0 + $0x58] sm:$0xff] }
   0x9   :  { %v839_v9 = vld [vmem:[%s1221_s0 + $0xc8] sm:$0xff]  ;;  %v840_v13 = vld [vmem:[%s1221_s0 + $0xd0] sm:$0xff]  ;;  %v833_v16 = vld [vmem:[%s1221_s0 + $0x98] sm:$0xff] }
   0xa   :  { %v841_v17 = vld [vmem:[%s1221_s0 + $0xd8] sm:$0xff]  ;;  %v818_v18 = vld [vmem:[%s1221_s0 + $0x20] sm:$0xff]  ;;  %v819_v22 = vld [vmem:[%s1221_s0 + $0x28] sm:$0xff] }
   0xb   :  { %v826_v19 = vld [vmem:[%s1221_s0 + $0x60] sm:$0xff]  ;;  %v827_v23 = vld [vmem:[%s1221_s0 + $0x68] sm:$0xff]  ;;  %v820_v26 = vld [vmem:[%s1221_s0 + $0x30] sm:$0xff] }
   0xc   :  { %v834_v20 = vld [vmem:[%s1221_s0 + $0xa0] sm:$0xff]  ;;  %v835_v24 = vld [vmem:[%s1221_s0 + $0xa8] sm:$0xff]  ;;  %v828_v27 = vld [vmem:[%s1221_s0 + $0x70] sm:$0xff] }
   0xd   :  { %v842_v21 = vld [vmem:[%s1221_s0 + $0xe0] sm:$0xff]  ;;  %v843_v25 = vld [vmem:[%s1221_s0 + $0xe8] sm:$0xff]  ;;  %v836_v28 = vld [vmem:[%s1221_s0 + $0xb0] sm:$0xff] }
   0xe   :  { %v844_v29 = vld [vmem:[%s1221_s0 + $0xf0] sm:$0xff]  ;;  %v821_v30 = vld [vmem:[%s1221_s0 + $0x38] sm:$0xff] }
   0xf   :  { %v829_v31 = vld [vmem:[%s1221_s0 + $0x78] sm:$0xff] }
  0x10   :  { %v837_v32 = vld [vmem:[%s1221_s0 + $0xb8] sm:$0xff] }
  0x11   :  { %v845_v33 = vld [vmem:[%s1221_s0 + $0xf8] sm:$0xff]  ;;  %s1069_s0 = smov [#allocation2]  }
  0x12   :  { %s640_s17 = sshll.u32 %s1069_s0, 4  ;;  %s641_s17 = int_to_ptr.vmem [resolvable:$true] %s640_s17 }
  0x16   :  { %783 = vmatmul.msk.bf16.gmra.mxu0 %vm238_vm1, %v815_v6  ;;  %791 = vmatmul.msk.bf16.gmra.mxu1 %vm238_vm1, %v823_v7 }
  0x17   :  { %799 = vmatmul.msk.bf16.gmra.mxu2 %vm238_vm1, %v831_v8  ;;  %807 = vmatmul.msk.bf16.gmra.mxu3 %vm238_vm1, %v839_v9 }
  0x26   :  { %784 = vmatmul.msk.bf16.gmra.mxu0 %vm238_vm1, %v816_v10  ;;  %792 = vmatmul.msk.bf16.gmra.mxu1 %vm238_vm1, %v824_v11 }
  0x27   :  { %800 = vmatmul.msk.bf16.gmra.mxu2 %vm238_vm1, %v832_v12  ;;  %808 = vmatmul.msk.bf16.gmra.mxu3 %vm238_vm1, %v840_v13 }
  0x36   :  { %785 = vmatmul.msk.bf16.gmra.mxu0 %vm238_vm1, %v817_v14  ;;  %793 = vmatmul.msk.bf16.gmra.mxu1 %vm238_vm1, %v825_v15 }
  0x37   :  { %801 = vmatmul.msk.bf16.gmra.mxu2 %vm238_vm1, %v833_v16  ;;  %809 = vmatmul.msk.bf16.gmra.mxu3 %vm238_vm1, %v841_v17 }
  0x46   :  { %786 = vmatmul.msk.bf16.gmra.mxu0 %vm238_vm1, %v818_v18  ;;  %794 = vmatmul.msk.bf16.gmra.mxu1 %vm238_vm1, %v826_v19 }
  0x47   :  { %802 = vmatmul.msk.bf16.gmra.mxu2 %vm238_vm1, %v834_v20  ;;  %810 = vmatmul.msk.bf16.gmra.mxu3 %vm238_vm1, %v842_v21 }
  0x56   :  { %787 = vmatmul.msk.bf16.gmra.mxu0 %vm238_vm1, %v819_v22  ;;  %795 = vmatmul.msk.bf16.gmra.mxu1 %vm238_vm1, %v827_v23 }
  0x57   :  { %803 = vmatmul.msk.bf16.gmra.mxu2 %vm238_vm1, %v835_v24  ;;  %811 = vmatmul.msk.bf16.gmra.mxu3 %vm238_vm1, %v843_v25 }
  0x66   :  { %788 = vmatmul.msk.bf16.gmra.mxu0 %vm238_vm1, %v820_v26  ;;  %796 = vmatmul.msk.bf16.gmra.mxu1 %vm238_vm1, %v828_v27 }
  0x67   :  { %804 = vmatmul.msk.bf16.gmra.mxu2 %vm238_vm1, %v836_v28  ;;  %812 = vmatmul.msk.bf16.gmra.mxu3 %vm238_vm1, %v844_v29 }
  0x76   :  { %789 = vmatmul.msk.bf16.gmra.mxu0 %vm238_vm1, %v821_v30  ;;  %797 = vmatmul.msk.bf16.gmra.mxu1 %vm238_vm1, %v829_v31 }
  0x77   :  { %805 = vmatmul.msk.bf16.gmra.mxu2 %vm238_vm1, %v837_v32  ;;  %813 = vmatmul.msk.bf16.gmra.mxu3 %vm238_vm1, %v845_v33 }
  0x83   :  { %v348_v34 = vpop.f32.mrf.mxu0  ;;  %v388_v35 = vpop.f32.mrf.mxu1 }
  0x8a   :  { %v428_v36 = vpop.f32.mrf.mxu2  ;;  %v468_v37 = vpop.f32.mrf.mxu3 }
  0x8b   :  { %v350_v38 = vpop.f32.mrf.mxu0  ;;  %v390_v39 = vpop.f32.mrf.mxu1 }
  0x8c   :  { %v849_v40 = vpack.c.bf16 %v350_v38, %v348_v34  ;;  %v889_v41 = vpack.c.bf16 %v390_v39, %v388_v35 }
  0x8e   :  { %850 = vst [vmem:[#allocation2] sm:$0xff] %v849_v40  }
  0x8f   :  { %1013 = vst [vmem:[#allocation2 + $0x40] sm:$0xff] %v889_v41  }
  0x92   :  { %v430_v42 = vpop.f32.mrf.mxu2  ;;  %v470_v43 = vpop.f32.mrf.mxu3 }
  0x93   :  { %v929_v44 = vpack.c.bf16 %v430_v42, %v428_v36  ;;  %v969_v45 = vpack.c.bf16 %v470_v43, %v468_v37  ;;  %v353_v46 = vpop.f32.mrf.mxu0  ;;  %v393_v47 = vpop.f32.mrf.mxu1 }
  0x95   :  { %1021 = vst [vmem:[#allocation2 + $0x80] sm:$0xff] %v929_v44  }
  0x96   :  { %1029 = vst [vmem:[#allocation2 + $0xc0] sm:$0xff] %v969_v45  }
  0x9a   :  { %v433_v48 = vpop.f32.mrf.mxu2  ;;  %v473_v49 = vpop.f32.mrf.mxu3 }
  0x9b   :  { %v355_v50 = vpop.f32.mrf.mxu0  ;;  %v395_v51 = vpop.f32.mrf.mxu1 }
  0x9c   :  { %v854_v52 = vpack.c.bf16 %v355_v50, %v353_v46  ;;  %v894_v53 = vpack.c.bf16 %v395_v51, %v393_v47 }
  0x9e   :  { %1006 = vst [vmem:[#allocation2 + $0x8] sm:$0xff] %v854_v52  }
  0x9f   :  { %1014 = vst [vmem:[#allocation2 + $0x48] sm:$0xff] %v894_v53  }
  0xa2   :  { %v435_v54 = vpop.f32.mrf.mxu2  ;;  %v475_v55 = vpop.f32.mrf.mxu3 }
  0xa3   :  { %v934_v56 = vpack.c.bf16 %v435_v54, %v433_v48  ;;  %v974_v57 = vpack.c.bf16 %v475_v55, %v473_v49  ;;  %v358_v58 = vpop.f32.mrf.mxu0  ;;  %v398_v59 = vpop.f32.mrf.mxu1 }
  0xa5   :  { %1022 = vst [vmem:[#allocation2 + $0x88] sm:$0xff] %v934_v56  }
  0xa6   :  { %1030 = vst [vmem:[#allocation2 + $0xc8] sm:$0xff] %v974_v57  }
  0xaa   :  { %v438_v60 = vpop.f32.mrf.mxu2  ;;  %v478_v61 = vpop.f32.mrf.mxu3 }
  0xab   :  { %v360_v62 = vpop.f32.mrf.mxu0  ;;  %v400_v63 = vpop.f32.mrf.mxu1 }
  0xac   :  { %v859_v0 = vpack.c.bf16 %v360_v62, %v358_v58  ;;  %v899_v1 = vpack.c.bf16 %v400_v63, %v398_v59 }
  0xae   :  { %1007 = vst [vmem:[#allocation2 + $0x10] sm:$0xff] %v859_v0  }
  0xaf   :  { %1015 = vst [vmem:[#allocation2 + $0x50] sm:$0xff] %v899_v1  }
  0xb2   :  { %v440_v2 = vpop.f32.mrf.mxu2  ;;  %v480_v3 = vpop.f32.mrf.mxu3 }
  0xb3   :  { %v939_v4 = vpack.c.bf16 %v440_v2, %v438_v60  ;;  %v979_v5 = vpack.c.bf16 %v480_v3, %v478_v61  ;;  %v363_v6 = vpop.f32.mrf.mxu0  ;;  %v403_v7 = vpop.f32.mrf.mxu1 }
  0xb5   :  { %1023 = vst [vmem:[#allocation2 + $0x90] sm:$0xff] %v939_v4  }
  0xb6   :  { %1031 = vst [vmem:[#allocation2 + $0xd0] sm:$0xff] %v979_v5  }
  0xba   :  { %v443_v8 = vpop.f32.mrf.mxu2  ;;  %v483_v9 = vpop.f32.mrf.mxu3 }
  0xbb   :  { %v365_v10 = vpop.f32.mrf.mxu0  ;;  %v405_v11 = vpop.f32.mrf.mxu1 }
  0xbc   :  { %v864_v12 = vpack.c.bf16 %v365_v10, %v363_v6  ;;  %v904_v13 = vpack.c.bf16 %v405_v11, %v403_v7 }
  0xbe   :  { %1008 = vst [vmem:[#allocation2 + $0x18] sm:$0xff] %v864_v12  }
  0xbf   :  { %1016 = vst [vmem:[#allocation2 + $0x58] sm:$0xff] %v904_v13  }
  0xc2   :  { %v445_v14 = vpop.f32.mrf.mxu2  ;;  %v485_v15 = vpop.f32.mrf.mxu3 }
  0xc3   :  { %v944_v16 = vpack.c.bf16 %v445_v14, %v443_v8  ;;  %v984_v17 = vpack.c.bf16 %v485_v15, %v483_v9  ;;  %v368_v18 = vpop.f32.mrf.mxu0  ;;  %v408_v19 = vpop.f32.mrf.mxu1 }
  0xc5   :  { %1024 = vst [vmem:[#allocation2 + $0x98] sm:$0xff] %v944_v16  }
  0xc6   :  { %1032 = vst [vmem:[#allocation2 + $0xd8] sm:$0xff] %v984_v17  }
  0xca   :  { %v448_v20 = vpop.f32.mrf.mxu2  ;;  %v488_v21 = vpop.f32.mrf.mxu3 }
  0xcb   :  { %v370_v22 = vpop.f32.mrf.mxu0  ;;  %v410_v23 = vpop.f32.mrf.mxu1 }
  0xcc   :  { %v869_v24 = vpack.c.bf16 %v370_v22, %v368_v18  ;;  %v909_v25 = vpack.c.bf16 %v410_v23, %v408_v19 }
  0xce   :  { %1009 = vst [vmem:[#allocation2 + $0x20] sm:$0xff] %v869_v24  }
  0xcf   :  { %1017 = vst [vmem:[#allocation2 + $0x60] sm:$0xff] %v909_v25  }
  0xd2   :  { %v450_v26 = vpop.f32.mrf.mxu2  ;;  %v490_v27 = vpop.f32.mrf.mxu3 }
  0xd3   :  { %v949_v28 = vpack.c.bf16 %v450_v26, %v448_v20  ;;  %v989_v29 = vpack.c.bf16 %v490_v27, %v488_v21  ;;  %v373_v30 = vpop.f32.mrf.mxu0  ;;  %v413_v31 = vpop.f32.mrf.mxu1 }
  0xd5   :  { %1025 = vst [vmem:[#allocation2 + $0xa0] sm:$0xff] %v949_v28  }
  0xd6   :  { %1033 = vst [vmem:[#allocation2 + $0xe0] sm:$0xff] %v989_v29  }
  0xda   :  { %v453_v32 = vpop.f32.mrf.mxu2  ;;  %v493_v33 = vpop.f32.mrf.mxu3 }
  0xdb   :  { %v375_v34 = vpop.f32.mrf.mxu0  ;;  %v415_v35 = vpop.f32.mrf.mxu1 }
  0xdc   :  { %v874_v36 = vpack.c.bf16 %v375_v34, %v373_v30  ;;  %v914_v37 = vpack.c.bf16 %v415_v35, %v413_v31 }
  0xde   :  { %1010 = vst [vmem:[#allocation2 + $0x28] sm:$0xff] %v874_v36  }
  0xdf   :  { %1018 = vst [vmem:[#allocation2 + $0x68] sm:$0xff] %v914_v37  }
  0xe2   :  { %v455_v38 = vpop.f32.mrf.mxu2  ;;  %v495_v39 = vpop.f32.mrf.mxu3 }
  0xe3   :  { %v954_v40 = vpack.c.bf16 %v455_v38, %v453_v32  ;;  %v994_v41 = vpack.c.bf16 %v495_v39, %v493_v33  ;;  %v378_v42 = vpop.f32.mrf.mxu0  ;;  %v418_v43 = vpop.f32.mrf.mxu1 }
  0xe5   :  { %1026 = vst [vmem:[#allocation2 + $0xa8] sm:$0xff] %v954_v40  }
  0xe6   :  { %1034 = vst [vmem:[#allocation2 + $0xe8] sm:$0xff] %v994_v41  }
  0xea   :  { %v458_v44 = vpop.f32.mrf.mxu2  ;;  %v498_v45 = vpop.f32.mrf.mxu3 }
  0xeb   :  { %v380_v46 = vpop.f32.mrf.mxu0  ;;  %v420_v47 = vpop.f32.mrf.mxu1 }
  0xec   :  { %v879_v48 = vpack.c.bf16 %v380_v46, %v378_v42  ;;  %v919_v49 = vpack.c.bf16 %v420_v47, %v418_v43 }
  0xee   :  { %1011 = vst [vmem:[#allocation2 + $0x30] sm:$0xff] %v879_v48  }
  0xef   :  { %1019 = vst [vmem:[#allocation2 + $0x70] sm:$0xff] %v919_v49  }
  0xf2   :  { %v460_v50 = vpop.f32.mrf.mxu2  ;;  %v500_v51 = vpop.f32.mrf.mxu3 }
  0xf3   :  { %v959_v52 = vpack.c.bf16 %v460_v50, %v458_v44  ;;  %v999_v53 = vpack.c.bf16 %v500_v51, %v498_v45  ;;  %v383_v54 = vpop.f32.mrf.mxu0  ;;  %v423_v55 = vpop.f32.mrf.mxu1 }
  0xf5   :  { %1027 = vst [vmem:[#allocation2 + $0xb0] sm:$0xff] %v959_v52  }
  0xf6   :  { %1035 = vst [vmem:[#allocation2 + $0xf0] sm:$0xff] %v999_v53  }
  0xfa   :  { %v463_v56 = vpop.f32.mrf.mxu2  ;;  %v503_v57 = vpop.f32.mrf.mxu3 }
  0xfb   :  { %v385_v58 = vpop.f32.mrf.mxu0  ;;  %v425_v59 = vpop.f32.mrf.mxu1 }
  0xfc   :  { %v884_v60 = vpack.c.bf16 %v385_v58, %v383_v54  ;;  %v924_v61 = vpack.c.bf16 %v425_v59, %v423_v55 }
  0xfe   :  { %1012 = vst [vmem:[#allocation2 + $0x38] sm:$0xff] %v884_v60  }
  0xff   :  { %1020 = vst [vmem:[#allocation2 + $0x78] sm:$0xff] %v924_v61  }
 0x102   :  { %v465_v62 = vpop.f32.mrf.mxu2  ;;  %v505_v63 = vpop.f32.mrf.mxu3 }
 0x103   :  { %v964_v0 = vpack.c.bf16 %v465_v62, %v463_v56  ;;  %v1004_v1 = vpack.c.bf16 %v505_v63, %v503_v57 }
 0x105   :  { %1028 = vst [vmem:[#allocation2 + $0xb8] sm:$0xff] %v964_v0  }
 0x106   :  { %1036 = vst [vmem:[#allocation2 + $0xf8] sm:$0xff] %v1004_v1  }
 0x107   :  { %648 = dma.vmem_to_hbm [thread:$0]  %s641_s17, 4096, %s643_s19, [#allocation3], %s1070_s20, %s1070_s20, %s1071_s21  }
 0x108   :  { %1067 = dma.done.wait [#allocation3], 4096  }
 0x109   :  { %1068 = vsyncadd [#allocation3], 4294963200 }
 0x10a   :  { %653 = vsyncpa [#allocation3], 1 }

</bundles_post_ra>
